<compile_context>
chip_gen: v6e
topology: v6e:2x2x1
jax: 0.10.0
libtpu: 0.0.40
codegen_flags: <defaults>
</compile_context>

<pallas_src>
from functools import lru_cache

import numpy as np
import jax
import jax.numpy as jnp
from jax.experimental import pallas as pl
from jax.experimental.pallas import tpu as pltpu

INP_DIM = 32
HID_DIM = 32
NUM_CLASSES = 8
NUM_LEAVES = 8          # leaves of the balanced binary tree (2*L-1 nodes)


# ----------------------------------------------------------------------------
# Kernel factory: the (host-static) level structure / child ids are closed
# over, so the whole walk unrolls into a handful of batched matmuls.
# ----------------------------------------------------------------------------
def _make_tree_kernel(levels, n_nodes, n_pad):
    H = HID_DIM

    def kernel(emb_ref,                    # VMEM f32 [n_leaves, INP] (leaf order)
               leaf_w_ref, leaf_b_ref,     # VMEM [INP, 3H], [1, 3H]
               nl_w_ref, nl_b_ref,         # VMEM [2H, 5H],  [1, 5H]
               sc_w_ref, sc_b_ref,         # VMEM [H, NC],   [1, NC]
               c_ref, h_ref, score_ref):   # VMEM outs [n_pad,H],[n_pad,H],[n_pad,NC]
        n_leaves = emb_ref.shape[0]

        # ---- all leaves in one batched matmul -------------------------------
        g = jnp.dot(emb_ref[...], leaf_w_ref[...],
                    preferred_element_type=jnp.float32) + leaf_b_ref[...]
        inp = jax.nn.sigmoid(g[:, 0:H])
        out = jax.nn.sigmoid(g[:, H:2 * H])
        upd = jnp.tanh(g[:, 2 * H:3 * H])
        c_lvl = inp * upd
        h_lvl = out * jax.nn.sigmoid(c_lvl)          # leaf: out * sigmoid(cell)

        c_blocks = [c_lvl]
        h_blocks = [h_lvl]
        # per-node register views (static row slices; never re-read from VMEM)
        c_of = {i: c_lvl[i:i + 1] for i in range(n_leaves)}
        h_of = {i: h_lvl[i:i + 1] for i in range(n_leaves)}
        next_id = n_leaves

        # ---- internal levels: one [m, 2H] x [2H, 5H] dot per level ----------
        for lefts, rights in levels:
            m = len(lefts)
            lh = jnp.concatenate([h_of[i] for i in lefts], axis=0)    # [m, H]
            rh = jnp.concatenate([h_of[i] for i in rights], axis=0)   # [m, H]
            lc = jnp.concatenate([c_of[i] for i in lefts], axis=0)    # [m, H]
            rc = jnp.concatenate([c_of[i] for i in rights], axis=0)   # [m, H]
            hlr = jnp.concatenate([lh, rh], axis=1)                   # [m, 2H]
            g = jnp.dot(hlr, nl_w_ref[...],
                        preferred_element_type=jnp.float32) + nl_b_ref[...]
            inp = jax.nn.sigmoid(g[:, 0:H])
            out = jax.nn.sigmoid(g[:, H:2 * H])
            upd = jnp.tanh(g[:, 2 * H:3 * H])
            fol = jax.nn.sigmoid(g[:, 3 * H:4 * H])
            forr = jax.nn.sigmoid(g[:, 4 * H:5 * H])
            c_lvl = inp * upd + fol * lc + forr * rc
            h_lvl = out * jnp.tanh(c_lvl)            # non-leaf: out * tanh(cell)
            c_blocks.append(c_lvl)
            h_blocks.append(h_lvl)
            for k in range(m):
                c_of[next_id + k] = c_lvl[k:k + 1]
                h_of[next_id + k] = h_lvl[k:k + 1]
            next_id += m

        # ---- assemble aligned slabs, single dense store each ----------------
        pad_rows = n_pad - n_nodes
        if pad_rows:
            zpad = jnp.zeros((pad_rows, H), jnp.float32)
            c_blocks.append(zpad)
            h_blocks.append(zpad)
        c_all = jnp.concatenate(c_blocks, axis=0)    # [n_pad, H]
        h_all = jnp.concatenate(h_blocks, axis=0)    # [n_pad, H]
        c_ref[...] = c_all
        h_ref[...] = h_all

        # ---- one batched score matmul for every node ------------------------
        score_ref[...] = jnp.dot(h_all, sc_w_ref[...],
                                 preferred_element_type=jnp.float32) + sc_b_ref[...]

    return kernel


# ----------------------------------------------------------------------------
# Compiled pallas_call per (level structure) -- cached so repeated trees with
# the same shape reuse the executable.
# ----------------------------------------------------------------------------
@lru_cache(maxsize=None)
def _build_fused_call(levels, n_leaves, n_nodes):
    n_pad = ((n_nodes + 7) // 8) * 8
    kernel = _make_tree_kernel(levels, n_nodes, n_pad)
    vmem = pl.BlockSpec(memory_space=pltpu.MemorySpace.VMEM)
    call = pl.pallas_call(
        kernel,
        out_shape=(jax.ShapeDtypeStruct((n_pad, HID_DIM), jnp.float32),
                   jax.ShapeDtypeStruct((n_pad, HID_DIM), jnp.float32),
                   jax.ShapeDtypeStruct((n_pad, NUM_CLASSES), jnp.float32)),
        in_specs=[vmem] * 7,
        out_specs=(vmem, vmem, vmem),
    )
    return jax.jit(call)


# ----------------------------------------------------------------------------
# Deterministic parameter init (same math as the nn.Module; weights stored
# transposed so y = x @ W + b, non-leaf left/right weights concatenated).
# ----------------------------------------------------------------------------
def init_params(key):
    ks = jax.random.split(key, 7)
    s = 0.1
    leaf_w = s * jax.random.normal(ks[0], (INP_DIM, 3 * HID_DIM), jnp.float32)
    leaf_b = s * jax.random.normal(ks[1], (1, 3 * HID_DIM), jnp.float32)
    # non-leaf: gates packed [inp | out | upd | fo_l | fo_r];
    # rows 0:H act on l_hid, rows H:2H act on r_hid (concatenated weight).
    nl_w = s * jax.random.normal(ks[2], (2 * HID_DIM, 5 * HID_DIM), jnp.float32)
    nl_b = s * jax.random.normal(ks[3], (1, 5 * HID_DIM), jnp.float32)
    sc_w = s * jax.random.normal(ks[4], (HID_DIM, NUM_CLASSES), jnp.float32)
    sc_b = s * jax.random.normal(ks[5], (1, NUM_CLASSES), jnp.float32)
    return dict(leaf_w=leaf_w, leaf_b=leaf_b, nl_w=nl_w, nl_b=nl_b,
                sc_w=sc_w, sc_b=sc_b)


# ----------------------------------------------------------------------------
# Tree structure + level-ordered topology (host side, like the PyTorch module)
# ----------------------------------------------------------------------------
class Tree:
    def __init__(self, idx=None, children=None, label=None):
        self.children = children or []
        self.num_child = len(self.children)
        self.idx = idx                # 1-based leaf index, as in the PyTorch code
        self.label = label
        self.temp = None
        self.output = None
        self.node_id = None


def build_balanced_tree(lo, hi):
    if lo == hi:
        return Tree(idx=lo)
    mid = (lo + hi) // 2
    return Tree(children=[build_balanced_tree(lo, mid),
                          build_balanced_tree(mid + 1, hi)])


def build_topology(tree):
    """Level-ordered renumbering: leaves first (contiguous), then internal nodes
    grouped by depth.  Returns (emb_order, levels, n_nodes) and assigns
    node.node_id.  levels[l] = (lefts, rights) child node-id tuples for level l+1."""
    def level_of(node):
        if node.num_child == 0:
            node._level = 0
        else:
            for ch in node.children:
                level_of(ch)
            node._level = max(ch._level for ch in node.children) + 1
    level_of(tree)

    per_level = [[] for _ in range(tree._level + 1)]

    def collect(node):
        for ch in node.children:
            collect(ch)
        per_level[node._level].append(node)
    collect(tree)

    nid = 0
    for lvl_nodes in per_level:
        for node in lvl_nodes:
            node.node_id = nid
            nid += 1

    emb_order = tuple(node.idx - 1 for node in per_level[0])
    levels = tuple(
        (tuple(n.children[0].node_id for n in per_level[lvl]),
         tuple(n.children[1].node_id for n in per_level[lvl]))
        for lvl in range(1, tree._level + 1))
    return emb_order, levels, nid


def tree_lstm_forward(tree, embeddings, params):
    """Mirrors binary_tree_lstm.forward with one fused kernel launch per tree.
    Populates node.temp = (cell, hidden) and node.output, returns root output."""
    # TODO(synk): the PyTorch module's criterion loss / integer labels have no
    # in-kernel equivalent here; loss is returned as 0.0.
    emb_order, levels, n_nodes = build_topology(tree)
    call = _build_fused_call(levels, len(emb_order), n_nodes)
    emb_leaf = embeddings[np.asarray(emb_order, dtype=np.int32)]     # [L, INP]
    c_all, h_all, scores = call(
        emb_leaf,
        params['leaf_w'], params['leaf_b'],
        params['nl_w'], params['nl_b'],
        params['sc_w'], params['sc_b'])

    def scatter(node):
        nid = node.node_id
        node.temp = (c_all[nid:nid + 1], h_all[nid:nid + 1])         # each [1, H]
        node.output = scores[nid:nid + 1]                            # [1, NC]
        for ch in node.children:
            scatter(ch)

    scatter(tree)
    return tree.output, 0.0


# ----------------------------------------------------------------------------
# Pure-JAX reference (recursive, for correctness check)
# ----------------------------------------------------------------------------
def tree_lstm_forward_ref(tree, embeddings, params):
    H = HID_DIM
    if tree.num_child == 0:
        x = embeddings[tree.idx - 1][None, :]
        g = x @ params['leaf_w'] + params['leaf_b']
        inp = jax.nn.sigmoid(g[:, :H]); out = jax.nn.sigmoid(g[:, H:2 * H])
        upd = jnp.tanh(g[:, 2 * H:3 * H])
        c = inp * upd
        h = out * jax.nn.sigmoid(c)
    else:
        for k in range(tree.num_child):
            tree_lstm_forward_ref(tree.children[k], embeddings, params)
        lc, lh = tree.children[0].temp
        rc, rh = tree.children[1].temp
        g = jnp.concatenate([lh, rh], axis=-1) @ params['nl_w'] + params['nl_b']
        inp = jax.nn.sigmoid(g[:, :H]); out = jax.nn.sigmoid(g[:, H:2 * H])
        upd = jnp.tanh(g[:, 2 * H:3 * H])
        fol = jax.nn.sigmoid(g[:, 3 * H:4 * H]); forr = jax.nn.sigmoid(g[:, 4 * H:5 * H])
        c = inp * upd + fol * lc + forr * rc
        h = out * jnp.tanh(c)
    tree.temp = (c, h)
    tree.output = h @ params['sc_w'] + params['sc_b']
    return tree.output, 0.0


def _collect_outputs(node, acc):
    acc.append(np.asarray(node.output))
    for ch in node.children:
        _collect_outputs(ch, acc)


# ----------------------------------------------------------------------------
if __name__ == "__main__":
    key = jax.random.PRNGKey(0)
    k_emb, k_par = jax.random.split(key)
    embeddings = jax.random.normal(k_emb, (NUM_LEAVES, INP_DIM), jnp.float32)
    params = init_params(k_par)

    # Fused Pallas forward
    tree = build_balanced_tree(1, NUM_LEAVES)
    root_out, _ = tree_lstm_forward(tree, embeddings, params)
    root_out = jax.block_until_ready(root_out)

    # Pure-JAX reference forward on an identically built tree
    ref_tree = build_balanced_tree(1, NUM_LEAVES)
    ref_root, _ = tree_lstm_forward_ref(ref_tree, embeddings, params)

    got, want = [], []
    _collect_outputs(tree, got)
    _collect_outputs(ref_tree, want)
    np.testing.assert_allclose(np.concatenate(got, axis=0),
                               np.concatenate(want, axis=0),
                               rtol=1e-5, atol=1e-5)
    np.testing.assert_allclose(np.asarray(root_out), np.asarray(ref_root),
                               rtol=1e-5, atol=1e-5)
    print("KERNEL_OK")
</pallas_src>

<mosaic_0001>
module attributes {stable_mosaic.version = 11 : i64} {
  func.func @kernel(%arg0: memref<8x32xf32, #tpu.memory_space<vmem>>, %arg1: memref<32x96xf32, #tpu.memory_space<vmem>>, %arg2: memref<1x96xf32, #tpu.memory_space<vmem>>, %arg3: memref<64x160xf32, #tpu.memory_space<vmem>>, %arg4: memref<1x160xf32, #tpu.memory_space<vmem>>, %arg5: memref<32x8xf32, #tpu.memory_space<vmem>>, %arg6: memref<1x8xf32, #tpu.memory_space<vmem>>, %arg7: memref<16x32xf32, #tpu.memory_space<vmem>>, %arg8: memref<16x32xf32, #tpu.memory_space<vmem>>, %arg9: memref<16x8xf32, #tpu.memory_space<vmem>>) attributes {dimension_semantics = [], scalar_prefetch = 0 : i64, scratch_operands = 0 : i64, tpu.core_type = #tpu.core_type<tc>} {
    %c0 = arith.constant 0 : index
    %c0_0 = arith.constant 0 : index
    %0 = vector.load %arg0[%c0, %c0_0] : memref<8x32xf32, #tpu.memory_space<vmem>>, vector<8x32xf32>
    %c0_1 = arith.constant 0 : index
    %c0_2 = arith.constant 0 : index
    %1 = vector.load %arg1[%c0_1, %c0_2] : memref<32x96xf32, #tpu.memory_space<vmem>>, vector<32x96xf32>
    %cst = arith.constant dense<0.000000e+00> : vector<8x96xf32>
    %2 = tpu.matmul %0, %1, %cst {dimension_numbers = #tpu.dot_dimension_numbers<[1], [0], [0], [1], [0, 0, 1, 1], [], []>} : vector<8x32xf32>, vector<32x96xf32>, vector<8x96xf32> -> vector<8x96xf32>
    %c0_3 = arith.constant 0 : index
    %c0_4 = arith.constant 0 : index
    %3 = vector.load %arg2[%c0_3, %c0_4] : memref<1x96xf32, #tpu.memory_space<vmem>>, vector<1x96xf32>
    %4 = vector.broadcast %3 : vector<1x96xf32> to vector<8x96xf32>
    %5 = arith.addf %2, %4 : vector<8x96xf32>
    %6 = vector.extract_strided_slice %5 {offsets = [0, 0], sizes = [8, 32], strides = [1, 1]} : vector<8x96xf32> to vector<8x32xf32>
    %7 = arith.negf %6 : vector<8x32xf32>
    %8 = math.exp %7 : vector<8x32xf32>
    %cst_5 = arith.constant 1.000000e+00 : f32
    %9 = vector.broadcast %cst_5 : f32 to vector<8x32xf32>
    %10 = arith.addf %9, %8 : vector<8x32xf32>
    %11 = arith.divf %9, %10 : vector<8x32xf32>
    %12 = vector.extract_strided_slice %5 {offsets = [0, 32], sizes = [8, 32], strides = [1, 1]} : vector<8x96xf32> to vector<8x32xf32>
    %13 = arith.negf %12 : vector<8x32xf32>
    %14 = math.exp %13 : vector<8x32xf32>
    %cst_6 = arith.constant 1.000000e+00 : f32
    %15 = vector.broadcast %cst_6 : f32 to vector<8x32xf32>
    %16 = arith.addf %15, %14 : vector<8x32xf32>
    %17 = arith.divf %15, %16 : vector<8x32xf32>
    %18 = vector.extract_strided_slice %5 {offsets = [0, 64], sizes = [8, 32], strides = [1, 1]} : vector<8x96xf32> to vector<8x32xf32>
    %19 = math.tanh %18 : vector<8x32xf32>
    %20 = arith.mulf %11, %19 : vector<8x32xf32>
    %21 = arith.negf %20 : vector<8x32xf32>
    %22 = math.exp %21 : vector<8x32xf32>
    %cst_7 = arith.constant 1.000000e+00 : f32
    %23 = vector.broadcast %cst_7 : f32 to vector<8x32xf32>
    %24 = arith.addf %23, %22 : vector<8x32xf32>
    %25 = arith.divf %23, %24 : vector<8x32xf32>
    %26 = arith.mulf %17, %25 : vector<8x32xf32>
    %27 = vector.extract_strided_slice %20 {offsets = [0, 0], sizes = [1, 32], strides = [1, 1]} : vector<8x32xf32> to vector<1x32xf32>
    %28 = vector.extract_strided_slice %20 {offsets = [1, 0], sizes = [1, 32], strides = [1, 1]} : vector<8x32xf32> to vector<1x32xf32>
    %29 = vector.extract_strided_slice %20 {offsets = [2, 0], sizes = [1, 32], strides = [1, 1]} : vector<8x32xf32> to vector<1x32xf32>
    %30 = vector.extract_strided_slice %20 {offsets = [3, 0], sizes = [1, 32], strides = [1, 1]} : vector<8x32xf32> to vector<1x32xf32>
    %31 = vector.extract_strided_slice %20 {offsets = [4, 0], sizes = [1, 32], strides = [1, 1]} : vector<8x32xf32> to vector<1x32xf32>
    %32 = vector.extract_strided_slice %20 {offsets = [5, 0], sizes = [1, 32], strides = [1, 1]} : vector<8x32xf32> to vector<1x32xf32>
    %33 = vector.extract_strided_slice %20 {offsets = [6, 0], sizes = [1, 32], strides = [1, 1]} : vector<8x32xf32> to vector<1x32xf32>
    %34 = vector.extract_strided_slice %20 {offsets = [7, 0], sizes = [1, 32], strides = [1, 1]} : vector<8x32xf32> to vector<1x32xf32>
    %35 = vector.extract_strided_slice %26 {offsets = [0, 0], sizes = [1, 32], strides = [1, 1]} : vector<8x32xf32> to vector<1x32xf32>
    %36 = vector.extract_strided_slice %26 {offsets = [1, 0], sizes = [1, 32], strides = [1, 1]} : vector<8x32xf32> to vector<1x32xf32>
    %37 = vector.extract_strided_slice %26 {offsets = [2, 0], sizes = [1, 32], strides = [1, 1]} : vector<8x32xf32> to vector<1x32xf32>
    %38 = vector.extract_strided_slice %26 {offsets = [3, 0], sizes = [1, 32], strides = [1, 1]} : vector<8x32xf32> to vector<1x32xf32>
    %39 = vector.extract_strided_slice %26 {offsets = [4, 0], sizes = [1, 32], strides = [1, 1]} : vector<8x32xf32> to vector<1x32xf32>
    %40 = vector.extract_strided_slice %26 {offsets = [5, 0], sizes = [1, 32], strides = [1, 1]} : vector<8x32xf32> to vector<1x32xf32>
    %41 = vector.extract_strided_slice %26 {offsets = [6, 0], sizes = [1, 32], strides = [1, 1]} : vector<8x32xf32> to vector<1x32xf32>
    %42 = vector.extract_strided_slice %26 {offsets = [7, 0], sizes = [1, 32], strides = [1, 1]} : vector<8x32xf32> to vector<1x32xf32>
    %43 = tpu.concatenate %35, %37, %39, %41 in 0 : vector<1x32xf32>, vector<1x32xf32>, vector<1x32xf32>, vector<1x32xf32> -> vector<4x32xf32>
    %44 = tpu.concatenate %36, %38, %40, %42 in 0 : vector<1x32xf32>, vector<1x32xf32>, vector<1x32xf32>, vector<1x32xf32> -> vector<4x32xf32>
    %45 = tpu.concatenate %27, %29, %31, %33 in 0 : vector<1x32xf32>, vector<1x32xf32>, vector<1x32xf32>, vector<1x32xf32> -> vector<4x32xf32>
    %46 = tpu.concatenate %28, %30, %32, %34 in 0 : vector<1x32xf32>, vector<1x32xf32>, vector<1x32xf32>, vector<1x32xf32> -> vector<4x32xf32>
    %47 = tpu.concatenate %43, %44 in 1 : vector<4x32xf32>, vector<4x32xf32> -> vector<4x64xf32>
    %c0_8 = arith.constant 0 : index
    %c0_9 = arith.constant 0 : index
    %48 = vector.load %arg3[%c0_8, %c0_9] : memref<64x160xf32, #tpu.memory_space<vmem>>, vector<64x160xf32>
    %cst_10 = arith.constant dense<0.000000e+00> : vector<4x160xf32>
    %49 = tpu.matmul %47, %48, %cst_10 {dimension_numbers = #tpu.dot_dimension_numbers<[1], [0], [0], [1], [0, 0, 1, 1], [], []>} : vector<4x64xf32>, vector<64x160xf32>, vector<4x160xf32> -> vector<4x160xf32>
    %c0_11 = arith.constant 0 : index
    %c0_12 = arith.constant 0 : index
    %50 = vector.load %arg4[%c0_11, %c0_12] : memref<1x160xf32, #tpu.memory_space<vmem>>, vector<1x160xf32>
    %51 = vector.broadcast %50 : vector<1x160xf32> to vector<4x160xf32>
    %52 = arith.addf %49, %51 : vector<4x160xf32>
    %53 = vector.extract_strided_slice %52 {offsets = [0, 0], sizes = [4, 32], strides = [1, 1]} : vector<4x160xf32> to vector<4x32xf32>
    %54 = arith.negf %53 : vector<4x32xf32>
    %55 = math.exp %54 : vector<4x32xf32>
    %cst_13 = arith.constant 1.000000e+00 : f32
    %56 = vector.broadcast %cst_13 : f32 to vector<4x32xf32>
    %57 = arith.addf %56, %55 : vector<4x32xf32>
    %58 = arith.divf %56, %57 : vector<4x32xf32>
    %59 = vector.extract_strided_slice %52 {offsets = [0, 32], sizes = [4, 32], strides = [1, 1]} : vector<4x160xf32> to vector<4x32xf32>
    %60 = arith.negf %59 : vector<4x32xf32>
    %61 = math.exp %60 : vector<4x32xf32>
    %cst_14 = arith.constant 1.000000e+00 : f32
    %62 = vector.broadcast %cst_14 : f32 to vector<4x32xf32>
    %63 = arith.addf %62, %61 : vector<4x32xf32>
    %64 = arith.divf %62, %63 : vector<4x32xf32>
    %65 = vector.extract_strided_slice %52 {offsets = [0, 64], sizes = [4, 32], strides = [1, 1]} : vector<4x160xf32> to vector<4x32xf32>
    %66 = math.tanh %65 : vector<4x32xf32>
    %67 = vector.extract_strided_slice %52 {offsets = [0, 96], sizes = [4, 32], strides = [1, 1]} : vector<4x160xf32> to vector<4x32xf32>
    %68 = arith.negf %67 : vector<4x32xf32>
    %69 = math.exp %68 : vector<4x32xf32>
    %cst_15 = arith.constant 1.000000e+00 : f32
    %70 = vector.broadcast %cst_15 : f32 to vector<4x32xf32>
    %71 = arith.addf %70, %69 : vector<4x32xf32>
    %72 = arith.divf %70, %71 : vector<4x32xf32>
    %73 = vector.extract_strided_slice %52 {offsets = [0, 128], sizes = [4, 32], strides = [1, 1]} : vector<4x160xf32> to vector<4x32xf32>
    %74 = arith.negf %73 : vector<4x32xf32>
    %75 = math.exp %74 : vector<4x32xf32>
    %cst_16 = arith.constant 1.000000e+00 : f32
    %76 = vector.broadcast %cst_16 : f32 to vector<4x32xf32>
    %77 = arith.addf %76, %75 : vector<4x32xf32>
    %78 = arith.divf %76, %77 : vector<4x32xf32>
    %79 = arith.mulf %58, %66 : vector<4x32xf32>
    %80 = arith.mulf %72, %45 : vector<4x32xf32>
    %81 = arith.addf %79, %80 : vector<4x32xf32>
    %82 = arith.mulf %78, %46 : vector<4x32xf32>
    %83 = arith.addf %81, %82 : vector<4x32xf32>
    %84 = math.tanh %83 : vector<4x32xf32>
    %85 = arith.mulf %64, %84 : vector<4x32xf32>
    %86 = vector.extract_strided_slice %83 {offsets = [0, 0], sizes = [1, 32], strides = [1, 1]} : vector<4x32xf32> to vector<1x32xf32>
    %87 = vector.extract_strided_slice %85 {offsets = [0, 0], sizes = [1, 32], strides = [1, 1]} : vector<4x32xf32> to vector<1x32xf32>
    %88 = vector.extract_strided_slice %83 {offsets = [1, 0], sizes = [1, 32], strides = [1, 1]} : vector<4x32xf32> to vector<1x32xf32>
    %89 = vector.extract_strided_slice %85 {offsets = [1, 0], sizes = [1, 32], strides = [1, 1]} : vector<4x32xf32> to vector<1x32xf32>
    %90 = vector.extract_strided_slice %83 {offsets = [2, 0], sizes = [1, 32], strides = [1, 1]} : vector<4x32xf32> to vector<1x32xf32>
    %91 = vector.extract_strided_slice %85 {offsets = [2, 0], sizes = [1, 32], strides = [1, 1]} : vector<4x32xf32> to vector<1x32xf32>
    %92 = vector.extract_strided_slice %83 {offsets = [3, 0], sizes = [1, 32], strides = [1, 1]} : vector<4x32xf32> to vector<1x32xf32>
    %93 = vector.extract_strided_slice %85 {offsets = [3, 0], sizes = [1, 32], strides = [1, 1]} : vector<4x32xf32> to vector<1x32xf32>
    %94 = tpu.concatenate %87, %91 in 0 : vector<1x32xf32>, vector<1x32xf32> -> vector<2x32xf32>
    %95 = tpu.concatenate %89, %93 in 0 : vector<1x32xf32>, vector<1x32xf32> -> vector<2x32xf32>
    %96 = tpu.concatenate %86, %90 in 0 : vector<1x32xf32>, vector<1x32xf32> -> vector<2x32xf32>
    %97 = tpu.concatenate %88, %92 in 0 : vector<1x32xf32>, vector<1x32xf32> -> vector<2x32xf32>
    %98 = tpu.concatenate %94, %95 in 1 : vector<2x32xf32>, vector<2x32xf32> -> vector<2x64xf32>
    %c0_17 = arith.constant 0 : index
    %c0_18 = arith.constant 0 : index
    %99 = vector.load %arg3[%c0_17, %c0_18] : memref<64x160xf32, #tpu.memory_space<vmem>>, vector<64x160xf32>
    %cst_19 = arith.constant dense<0.000000e+00> : vector<2x160xf32>
    %100 = tpu.matmul %98, %99, %cst_19 {dimension_numbers = #tpu.dot_dimension_numbers<[1], [0], [0], [1], [0, 0, 1, 1], [], []>} : vector<2x64xf32>, vector<64x160xf32>, vector<2x160xf32> -> vector<2x160xf32>
    %c0_20 = arith.constant 0 : index
    %c0_21 = arith.constant 0 : index
    %101 = vector.load %arg4[%c0_20, %c0_21] : memref<1x160xf32, #tpu.memory_space<vmem>>, vector<1x160xf32>
    %102 = vector.broadcast %101 : vector<1x160xf32> to vector<2x160xf32>
    %103 = arith.addf %100, %102 : vector<2x160xf32>
    %104 = vector.extract_strided_slice %103 {offsets = [0, 0], sizes = [2, 32], strides = [1, 1]} : vector<2x160xf32> to vector<2x32xf32>
    %105 = arith.negf %104 : vector<2x32xf32>
    %106 = math.exp %105 : vector<2x32xf32>
    %cst_22 = arith.constant 1.000000e+00 : f32
    %107 = vector.broadcast %cst_22 : f32 to vector<2x32xf32>
    %108 = arith.addf %107, %106 : vector<2x32xf32>
    %109 = arith.divf %107, %108 : vector<2x32xf32>
    %110 = vector.extract_strided_slice %103 {offsets = [0, 32], sizes = [2, 32], strides = [1, 1]} : vector<2x160xf32> to vector<2x32xf32>
    %111 = arith.negf %110 : vector<2x32xf32>
    %112 = math.exp %111 : vector<2x32xf32>
    %cst_23 = arith.constant 1.000000e+00 : f32
    %113 = vector.broadcast %cst_23 : f32 to vector<2x32xf32>
    %114 = arith.addf %113, %112 : vector<2x32xf32>
    %115 = arith.divf %113, %114 : vector<2x32xf32>
    %116 = vector.extract_strided_slice %103 {offsets = [0, 64], sizes = [2, 32], strides = [1, 1]} : vector<2x160xf32> to vector<2x32xf32>
    %117 = math.tanh %116 : vector<2x32xf32>
    %118 = vector.extract_strided_slice %103 {offsets = [0, 96], sizes = [2, 32], strides = [1, 1]} : vector<2x160xf32> to vector<2x32xf32>
    %119 = arith.negf %118 : vector<2x32xf32>
    %120 = math.exp %119 : vector<2x32xf32>
    %cst_24 = arith.constant 1.000000e+00 : f32
    %121 = vector.broadcast %cst_24 : f32 to vector<2x32xf32>
    %122 = arith.addf %121, %120 : vector<2x32xf32>
    %123 = arith.divf %121, %122 : vector<2x32xf32>
    %124 = vector.extract_strided_slice %103 {offsets = [0, 128], sizes = [2, 32], strides = [1, 1]} : vector<2x160xf32> to vector<2x32xf32>
    %125 = arith.negf %124 : vector<2x32xf32>
    %126 = math.exp %125 : vector<2x32xf32>
    %cst_25 = arith.constant 1.000000e+00 : f32
    %127 = vector.broadcast %cst_25 : f32 to vector<2x32xf32>
    %128 = arith.addf %127, %126 : vector<2x32xf32>
    %129 = arith.divf %127, %128 : vector<2x32xf32>
    %130 = arith.mulf %109, %117 : vector<2x32xf32>
    %131 = arith.mulf %123, %96 : vector<2x32xf32>
    %132 = arith.addf %130, %131 : vector<2x32xf32>
    %133 = arith.mulf %129, %97 : vector<2x32xf32>
    %134 = arith.addf %132, %133 : vector<2x32xf32>
    %135 = math.tanh %134 : vector<2x32xf32>
    %136 = arith.mulf %115, %135 : vector<2x32xf32>
    %137 = vector.extract_strided_slice %134 {offsets = [0, 0], sizes = [1, 32], strides = [1, 1]} : vector<2x32xf32> to vector<1x32xf32>
    %138 = vector.extract_strided_slice %136 {offsets = [0, 0], sizes = [1, 32], strides = [1, 1]} : vector<2x32xf32> to vector<1x32xf32>
    %139 = vector.extract_strided_slice %134 {offsets = [1, 0], sizes = [1, 32], strides = [1, 1]} : vector<2x32xf32> to vector<1x32xf32>
    %140 = vector.extract_strided_slice %136 {offsets = [1, 0], sizes = [1, 32], strides = [1, 1]} : vector<2x32xf32> to vector<1x32xf32>
    %141 = tpu.concatenate %138, %140 in 1 : vector<1x32xf32>, vector<1x32xf32> -> vector<1x64xf32>
    %c0_26 = arith.constant 0 : index
    %c0_27 = arith.constant 0 : index
    %142 = vector.load %arg3[%c0_26, %c0_27] : memref<64x160xf32, #tpu.memory_space<vmem>>, vector<64x160xf32>
    %cst_28 = arith.constant dense<0.000000e+00> : vector<1x160xf32>
    %143 = tpu.matmul %141, %142, %cst_28 {dimension_numbers = #tpu.dot_dimension_numbers<[1], [0], [0], [1], [0, 0, 1, 1], [], []>} : vector<1x64xf32>, vector<64x160xf32>, vector<1x160xf32> -> vector<1x160xf32>
    %c0_29 = arith.constant 0 : index
    %c0_30 = arith.constant 0 : index
    %144 = vector.load %arg4[%c0_29, %c0_30] : memref<1x160xf32, #tpu.memory_space<vmem>>, vector<1x160xf32>
    %145 = arith.addf %143, %144 : vector<1x160xf32>
    %146 = vector.extract_strided_slice %145 {offsets = [0, 0], sizes = [1, 32], strides = [1, 1]} : vector<1x160xf32> to vector<1x32xf32>
    %147 = arith.negf %146 : vector<1x32xf32>
    %148 = math.exp %147 : vector<1x32xf32>
    %cst_31 = arith.constant 1.000000e+00 : f32
    %149 = vector.broadcast %cst_31 : f32 to vector<1x32xf32>
    %150 = arith.addf %149, %148 : vector<1x32xf32>
    %151 = arith.divf %149, %150 : vector<1x32xf32>
    %152 = vector.extract_strided_slice %145 {offsets = [0, 32], sizes = [1, 32], strides = [1, 1]} : vector<1x160xf32> to vector<1x32xf32>
    %153 = arith.negf %152 : vector<1x32xf32>
    %154 = math.exp %153 : vector<1x32xf32>
    %cst_32 = arith.constant 1.000000e+00 : f32
    %155 = vector.broadcast %cst_32 : f32 to vector<1x32xf32>
    %156 = arith.addf %155, %154 : vector<1x32xf32>
    %157 = arith.divf %155, %156 : vector<1x32xf32>
    %158 = vector.extract_strided_slice %145 {offsets = [0, 64], sizes = [1, 32], strides = [1, 1]} : vector<1x160xf32> to vector<1x32xf32>
    %159 = math.tanh %158 : vector<1x32xf32>
    %160 = vector.extract_strided_slice %145 {offsets = [0, 96], sizes = [1, 32], strides = [1, 1]} : vector<1x160xf32> to vector<1x32xf32>
    %161 = arith.negf %160 : vector<1x32xf32>
    %162 = math.exp %161 : vector<1x32xf32>
    %cst_33 = arith.constant 1.000000e+00 : f32
    %163 = vector.broadcast %cst_33 : f32 to vector<1x32xf32>
    %164 = arith.addf %163, %162 : vector<1x32xf32>
    %165 = arith.divf %163, %164 : vector<1x32xf32>
    %166 = vector.extract_strided_slice %145 {offsets = [0, 128], sizes = [1, 32], strides = [1, 1]} : vector<1x160xf32> to vector<1x32xf32>
    %167 = arith.negf %166 : vector<1x32xf32>
    %168 = math.exp %167 : vector<1x32xf32>
    %cst_34 = arith.constant 1.000000e+00 : f32
    %169 = vector.broadcast %cst_34 : f32 to vector<1x32xf32>
    %170 = arith.addf %169, %168 : vector<1x32xf32>
    %171 = arith.divf %169, %170 : vector<1x32xf32>
    %172 = arith.mulf %151, %159 : vector<1x32xf32>
    %173 = arith.mulf %165, %137 : vector<1x32xf32>
    %174 = arith.addf %172, %173 : vector<1x32xf32>
    %175 = arith.mulf %171, %139 : vector<1x32xf32>
    %176 = arith.addf %174, %175 : vector<1x32xf32>
    %177 = math.tanh %176 : vector<1x32xf32>
    %178 = arith.mulf %157, %177 : vector<1x32xf32>
    %cst_35 = arith.constant 0.000000e+00 : f32
    %179 = vector.broadcast %cst_35 : f32 to vector<1x32xf32>
    %180 = tpu.concatenate %20, %83, %134, %176, %179 in 0 : vector<8x32xf32>, vector<4x32xf32>, vector<2x32xf32>, vector<1x32xf32>, vector<1x32xf32> -> vector<16x32xf32>
    %181 = tpu.concatenate %26, %85, %136, %178, %179 in 0 : vector<8x32xf32>, vector<4x32xf32>, vector<2x32xf32>, vector<1x32xf32>, vector<1x32xf32> -> vector<16x32xf32>
    %c0_36 = arith.constant 0 : index
    %c0_37 = arith.constant 0 : index
    %182 = vector.load %arg7[%c0_36, %c0_37] : memref<16x32xf32, #tpu.memory_space<vmem>>, vector<16x32xf32>
    tpu.vector_store %arg7[%c0_36, %c0_37], %180 {strides = array<i32>} : memref<16x32xf32, #tpu.memory_space<vmem>>, vector<16x32xf32>,
    %c0_38 = arith.constant 0 : index
    %c0_39 = arith.constant 0 : index
    %183 = vector.load %arg8[%c0_38, %c0_39] : memref<16x32xf32, #tpu.memory_space<vmem>>, vector<16x32xf32>
    tpu.vector_store %arg8[%c0_38, %c0_39], %181 {strides = array<i32>} : memref<16x32xf32, #tpu.memory_space<vmem>>, vector<16x32xf32>,
    %c0_40 = arith.constant 0 : index
    %c0_41 = arith.constant 0 : index
    %184 = vector.load %arg5[%c0_40, %c0_41] : memref<32x8xf32, #tpu.memory_space<vmem>>, vector<32x8xf32>
    %cst_42 = arith.constant dense<0.000000e+00> : vector<16x8xf32>
    %185 = tpu.matmul %181, %184, %cst_42 {dimension_numbers = #tpu.dot_dimension_numbers<[1], [0], [0], [1], [0, 0, 1, 1], [], []>} : vector<16x32xf32>, vector<32x8xf32>, vector<16x8xf32> -> vector<16x8xf32>
    %c0_43 = arith.constant 0 : index
    %c0_44 = arith.constant 0 : index
    %186 = vector.load %arg6[%c0_43, %c0_44] : memref<1x8xf32, #tpu.memory_space<vmem>>, vector<1x8xf32>
    %187 = vector.broadcast %186 : vector<1x8xf32> to vector<16x8xf32>
    %188 = arith.addf %185, %187 : vector<16x8xf32>
    %c0_45 = arith.constant 0 : index
    %c0_46 = arith.constant 0 : index
    %189 = vector.load %arg9[%c0_45, %c0_46] : memref<16x8xf32, #tpu.memory_space<vmem>>, vector<16x8xf32>
    tpu.vector_store %arg9[%c0_45, %c0_46], %188 {strides = array<i32>} : memref<16x8xf32, #tpu.memory_space<vmem>>, vector<16x8xf32>,
    return
  }
}

</mosaic_0001>

<bundles_post_ra>
// kernel: tpu_custom_call.1
= control target key start
LH: loop header
LB: loop body
LE: loop exit
PB: predicated region body
PF: predicated region fallthrough
CT: control target
= control target key end

     0   :  { %15 = vsyncpa [#allocation3], 0  ;;  %s1218_s0 = inlined_call_operand.vmem [shape: f32[8,32], index: 0, kind: input, shape index: {}]   ;;  %s1219_s1 = inlined_call_operand.vmem [shape: f32[32,96], index: 1, kind: input, shape index: {}]   ;;  %s1220_s2 = inlined_call_operand.vmem [shape: f32[1,96], index: 2, kind: input, shape index: {}]   ;;  %s1221_s3 = inlined_call_operand.hbm [shape: f32[64,160], index: 3, kind: input, shape index: {}]   ;;  %s1222_s4 = inlined_call_operand.hbm [shape: f32[1,160], index: 4, kind: input, shape index: {}]   ;;  %s1223_s5 = inlined_call_operand.vmem [shape: f32[32,8], index: 5, kind: input, shape index: {}]   ;;  %s1224_s6 = inlined_call_operand.vmem [shape: f32[1,8], index: 6, kind: input, shape index: {}]   ;;  %s1225_s7 = inlined_call_operand.hbm [shape: f32[16,32], index: 7, kind: output, shape index: {0}]   ;;  %s1226_s8 = inlined_call_operand.hbm [shape: f32[16,32], index: 8, kind: output, shape index: {1}]   ;;  %s1227_s9 = inlined_call_operand.vmem [shape: f32[16,8], index: 9, kind: output, shape index: {2}]  }
   0x1   :  { %16 = vsyncpa [#allocation6], 0 }
   0x2   :  { %17 = vsyncpa [#allocation4], 0 }
   0x3   :  { %18 = vsyncpa [#allocation9], 0  ;;  %s948_s30 = smov [#allocation2]  }
   0x4   :  { %s30_s10 = sshll.u32 %s948_s30, 4  ;;  %s31_s10 = int_to_ptr.vmem [resolvable:$true] %s30_s10 }
   0x5   :  { %s868_s11 = scalar_lea.vmem %s31_s10, 2048  ;;  %p873_p1 = scmp.lt.s32.totalorder %s31_s10, %s31_s10 }
   0x6   :  { %p869_p0 = scmp.ne.s32.totalorder %s31_s10, %s868_s11  ;;  %p874_p2 = scmp.lt.s32.totalorder %s868_s11, %s868_s11 }
   0x8   :  { %p875_p3 = por %p874_p2, %p873_p1 }
   0xa   :  { %p876_p4 = pnand %p875_p3, %p869_p0 }
   0xc   :  { %879 = shalt.err (!%p876_p4)
}
   0xd   :  { %s949_s12 = smov 256   ;;  %s950_s13 = smov 16  }
   0xe   :  { %36 = dma.hbm_to_vmem [thread:$0]  %s1221_s3, 2048, %s31_s10, [#allocation3], %s949_s12, %s949_s12, %s950_s13  }
   0xf   :  { %s951_s16 = smov [#allocation5]  }
  0x10   :  { %s43_s17 = sshll.u32 %s951_s16, 4  ;;  %s44_s17 = int_to_ptr.vmem [resolvable:$true] %s43_s17 }
  0x11   :  { %s888_s18 = scalar_lea.vmem %s44_s17, 32  ;;  %p893_p6 = scmp.lt.s32.totalorder %s44_s17, %s44_s17 }
  0x12   :  { %p889_p5 = scmp.ne.s32.totalorder %s44_s17, %s888_s18  ;;  %p894_p7 = scmp.lt.s32.totalorder %s888_s18, %s888_s18 }
  0x14   :  { %p895_p8 = por %p894_p7, %p893_p6 }
  0x16   :  { %p896_p9 = pnand %p895_p8, %p889_p5 }
  0x18   :  { %899 = shalt.err (!%p896_p9)
}
  0x19   :  { %46 = dma.hbm_to_vmem [thread:$0]  %s1222_s4, 32, %s44_s17, [#allocation6]  }
  0x1a   :  { %940 = dma.done.wait [#allocation3], 2048  }
  0x1b   :  { %941 = vsyncadd [#allocation3], 4294965248 }
  0x1c   :  { %942 = dma.done.wait [#allocation6], 32  }
  0x1d   :  { %943 = vsyncadd [#allocation6], 4294967264  ;;  %v952_v0 = vmov 0.0   ;;  %vm953_vm0 = vmmov 0   ;;  %v61_v1 = vld [vmem:[%s1219_s1 + $0x18] sm:$0xff]  ;;  %v60_v2 = vld [vmem:[%s1219_s1 + $0x10] sm:$0xff]  ;;  %v222_v61 = vlaneseq }
  0x1e   :  { %779 = vmatprep.subr.mxu0 %v952_v0  ;;  %787 = vmatprep.mubr.msk.f32.mxu0 %vm953_vm0, %v952_v0  ;;  %v59_v3 = vld [vmem:[%s1219_s1 + $0x8] sm:$0xff]  ;;  %v58_v4 = vld [vmem:[%s1219_s1] sm:$0xff]  ;;  %vm69_vm1 = vcmask 261120   ;;  %s954_s1 = smov 64   ;;  %vm173_vm2 = vcmask 1040384   ;;  %vm175_vm3 = vcmask 1041408  }
  0x1f   :  { %300 = vmatprep.mubr.f32.mxu1 %v952_v0  ;;  %780 = vmatpush3.msra.mxu0 %v61_v1  ;;  %v57_v5 = vld [vmem:[%s1218_s0] sm:$0xff]  ;;  %vm177_vm4 = vcmask 1042432   ;;  %v219_v27 = vld [vmem:[#allocation2 + $0x78] sm:$0xff]  ;;  %v1067_v28 = vld [vmem:[#allocation2 + $0x70] sm:$0xff]  ;;  %s955_s0 = smov 32   ;;  %vm232_vm5 = vcmask 523264  }
  0x20   :  { %781 = vmatprep.subr.mxu0 %v952_v0  ;;  %v752_v6 = vld [vmem:[%s1220_s2] ss:$0 sm:$0xff]  ;;  %v1069_v29 = vld [vmem:[#allocation2 + $0x68] sm:$0xff]  ;;  %252 = vmatprep.subr.mxu1 %v219_v27  ;;  %v1075_v32 = vld [vmem:[#allocation2 + $0x58] sm:$0xff]  ;;  %s956_s2 = smov 96   ;;  %v223_v62 = vshrl.u32 %v222_v61, 7 }
  0x21   :  { %782 = vmatpush3.msra.mxu0 %v60_v2  ;;  %v1071_v31 = vld [vmem:[#allocation2 + $0x60] sm:$0xff]  ;;  %253 = vmatpush1.msra.mxu1 %v1067_v28  ;;  %v1078_v33 = vld [vmem:[#allocation2 + $0x50] sm:$0xff]  ;;  %v1082_v34 = vld [vmem:[#allocation2 + $0x48] sm:$0xff]  ;;  %vm596_vm6 = vcmask 1043456   ;;  %vm598_vm7 = vcmask 1045504   ;;  %vm600_vm8 = vcmask 1046528  }
  0x22   :  { %783 = vmatprep.subr.mxu0 %v952_v0  ;;  %254 = vmatprep.subr.mxu1 %v1069_v29  ;;  %v212_v35 = vld [vmem:[#allocation2 + $0x40] sm:$0xff]  ;;  %v211_v36 = vld [vmem:[#allocation2 + $0x38] sm:$0xff]  ;;  %v210_v37 = vld [vmem:[#allocation2 + $0x30] sm:$0xff]  ;;  %v224_v63 = vsub.s32 0, %v223_v62  ;;  %s958_s19 = smov [#allocation8]  }
  0x23   :  { %784 = vmatpush3.msra.mxu0 %v59_v3  ;;  %255 = vmatpush1.msra.mxu1 %v1071_v31  ;;  %v209_v38 = vld [vmem:[#allocation2 + $0x28] sm:$0xff]  ;;  %v208_v39 = vld [vmem:[#allocation2 + $0x20] sm:$0xff]  ;;  %v207_v40 = vld [vmem:[#allocation2 + $0x18] sm:$0xff]  ;;  %s731_s20 = sshll.u32 %s958_s19, 4  ;;  %s732_s20 = int_to_ptr.vmem [resolvable:$true] %s731_s20 }
  0x24   :  { %785 = vmatprep.subr.mxu0 %v952_v0  ;;  %256 = vmatprep.subr.mxu1 %v1075_v32  ;;  %v206_v41 = vld [vmem:[#allocation2 + $0x10] sm:$0xff]  ;;  %v205_v42 = vld [vmem:[#allocation2 + $0x8] sm:$0xff]  ;;  %v204_v43 = vld [vmem:[#allocation2] sm:$0xff] }
  0x25   :  { %786 = vmatpush3.msra.mxu0 %v58_v4  ;;  %257 = vmatpush1.msra.mxu1 %v1078_v33 }
  0x26   :  { %788 = vmatmul.mubr.msk.f32.vlgmr.msra.gmra.mxu0 %vm69_vm1, %v57_v5  ;;  %381 = vmatprep.subr.mxu0 %v219_v27 }
  0x27   :  { %429 = vmatprep.mubr.f32.mxu0 %v952_v0  ;;  %382 = vmatpush1.msra.mxu0 %v1067_v28 }
  0x28   :  { %383 = vmatprep.subr.mxu0 %v1069_v29  ;;  %258 = vmatprep.subr.mxu1 %v1082_v34 }
  0x29   :  { %384 = vmatpush1.msra.mxu0 %v1071_v31  ;;  %259 = vmatpush1.msra.mxu1 %v212_v35 }
  0x2a   :  { %385 = vmatprep.subr.mxu0 %v1075_v32  ;;  %260 = vmatprep.subr.mxu1 %v211_v36 }
  0x2b   :  { %386 = vmatpush1.msra.mxu0 %v1078_v33  ;;  %261 = vmatpush1.msra.mxu1 %v210_v37 }
  0x2c   :  { %387 = vmatprep.subr.mxu0 %v1082_v34  ;;  %262 = vmatprep.subr.mxu1 %v209_v38 }
  0x2d   :  { %388 = vmatpush1.msra.mxu0 %v212_v35  ;;  %263 = vmatpush1.msra.mxu1 %v208_v39 }
  0x2e   :  { %389 = vmatprep.subr.mxu0 %v211_v36  ;;  %264 = vmatprep.subr.mxu1 %v207_v40 }
  0x2f   :  { %390 = vmatpush1.msra.mxu0 %v210_v37  ;;  %265 = vmatpush1.msra.mxu1 %v206_v41 }
  0x30   :  { %391 = vmatprep.subr.mxu0 %v209_v38  ;;  %266 = vmatprep.subr.mxu1 %v205_v42 }
  0x31   :  { %392 = vmatpush1.msra.mxu0 %v208_v39  ;;  %267 = vmatpush1.msra.mxu1 %v204_v43 }
  0x32   :  { %393 = vmatprep.subr.mxu0 %v207_v40  ;;  %498 = vmatprep.subr.mxu1 %v219_v27 }
  0x33   :  { %394 = vmatpush1.msra.mxu0 %v206_v41 }
  0x34   :  { %395 = vmatprep.subr.mxu0 %v205_v42 }
  0x35   :  { %396 = vmatpush1.msra.mxu0 %v204_v43 }
  0xe6   :  { %v139_v7 = vpop.f32.mrf.mxu0 }
  0xe7   :  { %v140_v8 = vadd.f32 %v752_v6, %v139_v7 }
  0xe8   :  { %v789_v9 = vpop.f32.mrf.mxu0 }
  0xe9   :  { %814 = vtanh.f32 %v140_v8  ;;  %v754_v11 = vmul.f32 -1.442695, %v140_v8 }
  0xeb   :  { %816 = vpow2.f32 %v754_v11  ;;  %v228_v11 = vsub.s32 1, %v223_v62 }
  0xf6   :  { %v815_v10 = vpop.eup %814 }
  0xf7   :  { %151 = vrot.lane.b32.xlu0 %v815_v10, %s954_s1 }
  0xf8   :  { %v817_v12 = vpop.eup %816 }
  0xf9   :  { %v146_v13 = vadd.f32 1.0, %v817_v12 }
  0xfb   :  { %818 = vrcp.f32 %v146_v13 }
 0x108   :  { %v1044_v14 = vpop.eup %818 }
 0x169   :  { %v152_v15 = vpop.permute.xlu0 %151 }
 0x16a   :  { %v1047_v16 = vmul.f32 %v1044_v14, %v152_v15 }
 0x16c   :  { %v755_v17 = vmul.f32 -1.442695, %v1047_v16  ;;  %610 = vst.msk [vmem:[#allocation7] sm:$0xff] %vm69_vm1, %v1047_v16  ;;  %v185_v18 = vrot.slane %v1047_v16, 1  ;;  %v187_v19 = vrot.slane %v1047_v16, 2  ;;  %v189_v20 = vrot.slane %v1047_v16, 3 }
 0x16d   :  { %v194_v21 = vrot.slane %v1047_v16, 4 }
 0x16e   :  { %820 = vpow2.f32 %v755_v17  ;;  %v196_v22 = vsel %vm173_vm2, %v185_v18, %v187_v19  ;;  %v191_v50 = vsel %vm173_vm2, %v1047_v16, %v185_v18 }
 0x16f   :  { %v197_v23 = vsel %vm175_vm3, %v196_v22, %v189_v20  ;;  %v192_v55 = vsel %vm175_vm3, %v191_v50, %v187_v19 }
 0x170   :  { %v1065_v24 = vsel %vm177_vm4, %v197_v23, %v194_v21  ;;  %v193_v56 = vsel %vm177_vm4, %v192_v55, %v189_v20 }
 0x17b   :  { %v821_v25 = vpop.eup %820 }
 0x17c   :  { %v158_v26 = vadd.f32 1.0, %v821_v25 }
 0x17e   :  { %822 = vrcp.f32 %v158_v26 }
 0x18b   :  { %v823_v30 = vpop.eup %822 }
 0x18c   :  { %162 = vrot.lane.b32.xlu0 %v823_v30, %s955_s0 }
 0x1fe   :  { %v163_v44 = vpop.permute.xlu0 %162 }
 0x1ff   :  { %v1093_v45 = vmul.f32 %v1044_v14, %v163_v44 }
 0x201   :  { %v167_v46 = vrot.slane %v1093_v45, 1  ;;  %v169_v47 = vrot.slane %v1093_v45, 2  ;;  %v171_v48 = vrot.slane %v1093_v45, 3  ;;  %v179_v57 = vrot.slane %v1093_v45, 4 }
 0x203   :  { %v174_v49 = vsel %vm173_vm2, %v1093_v45, %v167_v46  ;;  %v181_v51 = vsel %vm173_vm2, %v167_v46, %v169_v47 }
 0x204   :  { %v176_v52 = vsel %vm175_vm3, %v174_v49, %v169_v47  ;;  %v182_v53 = vsel %vm175_vm3, %v181_v51, %v171_v48 }
 0x205   :  { %v178_v54 = vsel %vm177_vm4, %v176_v52, %v171_v48  ;;  %v183_v58 = vsel %vm177_vm4, %v182_v53, %v179_v57 }
 0x206   :  { %200 = vrot.lane.b32.xlu1 %v178_v54, %s956_s2 }
 0x20a   :  { %326 = vrot.lane.b32.xlu1 %v193_v56, %s956_s2 }
 0x278   :  { %v201_v59 = vpop.permute.xlu1 %200 }
 0x279   :  { %v203_v60 = vsel %vm69_vm1, %v201_v59, %v183_v58 }
 0x27a   :  { %756 = vmatmul.mubr.msk.f32.vlgmr.msra.gmra.mxu1 %vm232_vm5, %v203_v60 }
 0x27b   :  { %499 = vmatpush1.msra.mxu1 %v1067_v28  ;;  %546 = vmatprep.mubr.f32.mxu1 %v952_v0  ;;  %v220_v0 = vld [vmem:[#allocation5] sm:$0x3] }
 0x27c   :  { %500 = vmatprep.subr.mxu1 %v1069_v29  ;;  %v1127_v1 = vrot.slane %v220_v0, %v224_v63  ;;  %v327_v9 = vpop.permute.xlu1 %326  ;;  %v1132_v12 = vrot.slane %v220_v0, %v228_v11 }
 0x27d   :  { %501 = vmatpush1.msra.mxu1 %v1071_v31 }
 0x27e   :  { %502 = vmatprep.subr.mxu1 %v1075_v32 }
 0x27f   :  { %503 = vmatpush1.msra.mxu1 %v1078_v33 }
 0x280   :  { %504 = vmatprep.subr.mxu1 %v1082_v34 }
 0x281   :  { %505 = vmatpush1.msra.mxu1 %v212_v35 }
 0x282   :  { %506 = vmatprep.subr.mxu1 %v211_v36 }
 0x283   :  { %507 = vmatpush1.msra.mxu1 %v210_v37 }
 0x284   :  { %508 = vmatprep.subr.mxu1 %v209_v38 }
 0x285   :  { %509 = vmatpush1.msra.mxu1 %v208_v39 }
 0x286   :  { %510 = vmatprep.subr.mxu1 %v207_v40 }
 0x287   :  { %511 = vmatpush1.msra.mxu1 %v206_v41 }
 0x288   :  { %512 = vmatprep.subr.mxu1 %v205_v42 }
 0x289   :  { %513 = vmatpush1.msra.mxu1 %v204_v43 }
 0x33a   :  { %v302_v2 = vpop.f32.mrf.mxu1 }
 0x33b   :  { %v303_v3 = vadd.f32 %v302_v2, %v1127_v1 }
 0x33c   :  { %v304_v13 = vpop.f32.mrf.mxu1 }
 0x33d   :  { %v757_v4 = vmul.f32 -1.442695, %v303_v3  ;;  %824 = vtanh.f32 %v303_v3  ;;  %v305_v14 = vadd.f32 %v304_v13, %v1132_v12 }
 0x33f   :  { %826 = vpow2.f32 %v757_v4  ;;  %v758_v15 = vmul.f32 -1.442695, %v305_v14 }
 0x34a   :  { %v825_v5 = vpop.eup %824 }
 0x34b   :  { %321 = vrot.lane.b32.xlu0 %v825_v5, %s954_s1 }
 0x34c   :  { %v827_v6 = vpop.eup %826 }
 0x34d   :  { %v310_v7 = vadd.f32 1.0, %v827_v6 }
 0x34f   :  { %828 = vrcp.f32 %v310_v7 }
 0x350   :  { %830 = vpow2.f32 %v758_v15 }
 0x35c   :  { %v829_v8 = vpop.eup %828 }
 0x35d   :  { %v329_v10 = vmul.f32 %v829_v8, %v327_v9  ;;  %v831_v16 = vpop.eup %830 }
 0x35e   :  { %v317_v17 = vadd.f32 1.0, %v831_v16 }
 0x35f   :  { %331 = vrot.lane.b32.xlu1 %v329_v10, %s955_s0 }
 0x360   :  { %832 = vrcp.f32 %v317_v17 }
 0x36d   :  { %v833_v19 = vpop.eup %832 }
 0x36e   :  { %v335_v22 = vmul.f32 %v833_v19, %v1065_v24 }
 0x3bd   :  { %v322_v18 = vpop.permute.xlu0 %321 }
 0x3be   :  { %v324_v20 = vmul.f32 %v829_v8, %v322_v18 }
 0x3d1   :  { %v332_v21 = vpop.permute.xlu1 %331 }
 0x3d2   :  { %v334_v23 = vadd.f32 %v332_v21, %v324_v20 }
 0x3d4   :  { %v1136_v25 = vadd.f32 %v335_v22, %v334_v23 }
 0x3d6   :  { %834 = vtanh.f32 %v1136_v25  ;;  %v351_v27 = vrot.slane %v1136_v25, 1  ;;  %v354_v52 = vrot.slane %v1136_v25, 2 }
 0x3d8   :  { %v353_v28 = vsel %vm173_vm2, %v1136_v25, %v351_v27  ;;  %v356_v55 = vsel %vm173_vm2, %v351_v27, %v354_v52 }
 0x3e3   :  { %v835_v26 = vpop.eup %834 }
 0x3e4   :  { %339 = vrot.lane.b32.xlu0 %v835_v26, %s955_s0 }
 0x3e8   :  { %455 = vrot.lane.b32.xlu0 %v353_v28, %s956_s2 }
 0x456   :  { %v340_v29 = vpop.permute.xlu0 %339 }
 0x457   :  { %v1144_v30 = vmul.f32 %v829_v8, %v340_v29 }
 0x459   :  { %v344_v24 = vrot.slane %v1144_v30, 1  ;;  %v347_v32 = vrot.slane %v1144_v30, 2 }
 0x45a   :  { %v456_v43 = vpop.permute.xlu0 %455 }
 0x45b   :  { %v346_v31 = vsel %vm173_vm2, %v1144_v30, %v344_v24  ;;  %v349_v33 = vsel %vm173_vm2, %v344_v24, %v347_v32  ;;  %v623_v32 = vld [vmem:[%s1223_s5 + $0x10] sm:$0xff] }
 0x45c   :  { %358 = vrot.lane.b32.xlu1 %v346_v31, %s956_s2  ;;  %v624_v31 = vld [vmem:[%s1223_s5 + $0x18] sm:$0xff] }
 0x45d   :  { %790 = vmatprep.subr.mxu0 %v624_v31 }
 0x4ce   :  { %v359_v34 = vpop.permute.xlu1 %358 }
 0x4cf   :  { %v361_v35 = vsel %vm69_vm1, %v359_v34, %v349_v33  ;;  %v621_v33 = vld [vmem:[%s1223_s5] sm:$0xff] }
 0x4d0   :  { %759 = vmatmul.mubr.msk.f32.vlgmr.msra.gmra.mxu0 %vm232_vm5, %v361_v35 }
 0x4d1   :  { %791 = vmatpush3.msra.mxu0 %v624_v31 }
 0x4d2   :  { %792 = vmatprep.subr.mxu0 %v623_v32 }
 0x4d3   :  { %793 = vmatpush3.msra.mxu0 %v623_v32 }
 0x590   :  { %v431_v36 = vpop.f32.mrf.mxu0 }
 0x591   :  { %v432_v37 = vadd.f32 %v431_v36, %v1127_v1 }
 0x592   :  { %v433_v46 = vpop.f32.mrf.mxu0 }
 0x593   :  { %v760_v38 = vmul.f32 -1.442695, %v432_v37  ;;  %836 = vtanh.f32 %v432_v37  ;;  %v434_v47 = vadd.f32 %v433_v46, %v1132_v12 }
 0x595   :  { %838 = vpow2.f32 %v760_v38  ;;  %v761_v48 = vmul.f32 -1.442695, %v434_v47 }
 0x5a0   :  { %v837_v39 = vpop.eup %836 }
 0x5a1   :  { %450 = vrot.lane.b32.xlu1 %v837_v39, %s954_s1 }
 0x5a2   :  { %v839_v40 = vpop.eup %838 }
 0x5a3   :  { %v439_v41 = vadd.f32 1.0, %v839_v40 }
 0x5a5   :  { %840 = vrcp.f32 %v439_v41 }
 0x5a6   :  { %842 = vpow2.f32 %v761_v48 }
 0x5b2   :  { %v841_v42 = vpop.eup %840 }
 0x5b3   :  { %v458_v44 = vmul.f32 %v841_v42, %v456_v43  ;;  %v843_v49 = vpop.eup %842 }
 0x5b4   :  { %v446_v50 = vadd.f32 1.0, %v843_v49 }
 0x5b5   :  { %460 = vrot.lane.b32.xlu0 %v458_v44, %s955_s0 }
 0x5b6   :  { %844 = vrcp.f32 %v446_v50 }
 0x5c3   :  { %v845_v53 = vpop.eup %844 }
 0x5c4   :  { %v464_v57 = vmul.f32 %v845_v53, %v356_v55 }
 0x613   :  { %v451_v51 = vpop.permute.xlu1 %450 }
 0x614   :  { %v453_v54 = vmul.f32 %v841_v42, %v451_v51 }
 0x627   :  { %v461_v56 = vpop.permute.xlu0 %460 }
 0x628   :  { %v463_v58 = vadd.f32 %v461_v56, %v453_v54 }
 0x62a   :  { %v465_v59 = vadd.f32 %v464_v57, %v463_v58 }
 0x62c   :  { %846 = vtanh.f32 %v465_v59  ;;  %v581_v20 = vrot.slane %v465_v59, 1  ;;  %v591_v26 = vrot.slane %v465_v59, 4 }
 0x639   :  { %v847_v60 = vpop.eup %846 }
 0x63a   :  { %468 = vrot.lane.b32.xlu1 %v847_v60, %s955_s0 }
 0x63e   :  { %572 = vrot.lane.b32.xlu1 %v465_v59, %s956_s2 }
 0x6ac   :  { %v469_v61 = vpop.permute.xlu1 %468 }
 0x6ad   :  { %v1162_v62 = vmul.f32 %v841_v42, %v469_v61 }
 0x6af   :  { %473 = vrot.lane.b32.xlu0 %v1162_v62, %s956_s2  ;;  %v476_v63 = vrot.slane %v1162_v62, 1  ;;  %v602_v35 = vrot.slane %v1162_v62, 4 }
 0x6b0   :  { %v573_v10 = vpop.permute.xlu1 %572 }
 0x6b1   :  { %v607_v39 = vsel %vm596_vm6, %v1144_v30, %v602_v35 }
 0x721   :  { %v474_v0 = vpop.permute.xlu0 %473 }
 0x722   :  { %v478_v2 = vsel %vm69_vm1, %v474_v0, %v476_v63 }
 0x723   :  { %762 = vmatmul.mubr.msk.f32.vlgmr.msra.gmra.mxu1 %vm232_vm5, %v478_v2 }
 0x7e3   :  { %v548_v3 = vpop.f32.mrf.mxu1 }
 0x7e4   :  { %v549_v4 = vadd.f32 %v548_v3, %v1127_v1 }
 0x7e5   :  { %v550_v13 = vpop.f32.mrf.mxu1 }
 0x7e6   :  { %v763_v5 = vmul.f32 -1.442695, %v549_v4  ;;  %848 = vtanh.f32 %v549_v4  ;;  %v551_v1 = vadd.f32 %v550_v13, %v1132_v12  ;;  %v597_v12 = vsel %vm596_vm6, %v1136_v25, %v591_v26  ;;  %v622_v25 = vld [vmem:[%s1223_s5 + $0x8] sm:$0xff]  ;;  %s957_s5 = smov [#allocation7]  }
 0x7e7   :  { %794 = vmatprep.subr.mxu0 %v622_v25  ;;  %s719_s18 = sshll.u32 %s957_s5, 4  ;;  %s720_s18 = int_to_ptr.vmem [resolvable:$true] %s719_s18 }
 0x7e8   :  { %850 = vpow2.f32 %v763_v5  ;;  %v764_v14 = vmul.f32 -1.442695, %v551_v1  ;;  %795 = vmatpush3.msra.mxu0 %v622_v25  ;;  %s900_s3 = scalar_lea.vmem %s720_s18, 256  ;;  %p905_p11 = scmp.lt.s32.totalorder %s720_s18, %s720_s18 }
 0x7e9   :  { %796 = vmatprep.subr.mxu0 %v621_v33  ;;  %p901_p10 = scmp.ne.s32.totalorder %s720_s18, %s900_s3  ;;  %p906_p12 = scmp.lt.s32.totalorder %s900_s3, %s900_s3 }
 0x7ea   :  { %797 = vmatpush3.msra.mxu0 %v621_v33 }
 0x7eb   :  { %p907_p13 = por %p906_p12, %p905_p11 }
 0x7ed   :  { %p908_p0 = pnand %p907_p13, %p901_p10 }
 0x7f3   :  { %v849_v6 = vpop.eup %848 }
 0x7f4   :  { %567 = vrot.lane.b32.xlu0 %v849_v6, %s954_s1 }
 0x7f5   :  { %v851_v7 = vpop.eup %850 }
 0x7f6   :  { %v556_v8 = vadd.f32 1.0, %v851_v7 }
 0x7f8   :  { %852 = vrcp.f32 %v556_v8 }
 0x7f9   :  { %854 = vpow2.f32 %v764_v14 }
 0x805   :  { %v853_v9 = vpop.eup %852 }
 0x806   :  { %v575_v11 = vmul.f32 %v853_v9, %v573_v10  ;;  %v855_v15 = vpop.eup %854 }
 0x807   :  { %v563_v16 = vadd.f32 1.0, %v855_v15 }
 0x808   :  { %577 = vrot.lane.b32.xlu1 %v575_v11, %s955_s0 }
 0x809   :  { %856 = vrcp.f32 %v563_v16 }
 0x80c   :  { %613 = vrot.lane.b32.xlu1 %v1093_v45, %s956_s2 }
 0x816   :  { %v857_v18 = vpop.eup %856 }
 0x817   :  { %v583_v22 = vmul.f32 %v857_v18, %v581_v20 }
 0x866   :  { %v568_v17 = vpop.permute.xlu0 %567 }
 0x867   :  { %v570_v19 = vmul.f32 %v853_v9, %v568_v17 }
 0x87a   :  { %v578_v21 = vpop.permute.xlu1 %577 }
 0x87b   :  { %v580_v23 = vadd.f32 %v578_v21, %v570_v19 }
 0x87d   :  { %v584_v27 = vadd.f32 %v583_v22, %v580_v23 }
 0x87e   :  { %v614_v28 = vpop.permute.xlu1 %613 }
 0x87f   :  { %858 = vtanh.f32 %v584_v27  ;;  %v594_v45 = vrot.slane %v584_v27, 2  ;;  %619 = vst.msk [vmem:[#allocation8] sm:$0xff] %vm69_vm1, %v614_v28  ;;  %798 = vmatprep.mubr.msk.f32.mxu0 %vm69_vm1, %v614_v28 }
 0x881   :  { %v599_v29 = vsel %vm598_vm7, %v597_v12, %v594_v45 }
 0x882   :  { %v601_v24 = vsel %vm600_vm8, %v599_v29, 0.0 }
 0x883   :  { %611 = vst.msk [vmem:[#allocation7 + $0x8] sm:$0xff] %vm69_vm1, %v601_v24 }
 0x88c   :  { %v859_v34 = vpop.eup %858 }
 0x88d   :  { %587 = vrot.lane.b32.xlu0 %v859_v34, %s955_s0 }
 0x8ff   :  { %v588_v36 = vpop.permute.xlu0 %587 }
 0x900   :  { %v590_v37 = vmul.f32 %v853_v9, %v588_v36 }
 0x902   :  { %v605_v38 = vrot.slane %v590_v37, 2 }
 0x904   :  { %v608_v40 = vsel %vm598_vm7, %v607_v39, %v605_v38 }
 0x905   :  { %v609_v41 = vsel %vm600_vm8, %v608_v40, 0.0 }
 0x906   :  { %615 = vrot.lane.b32.xlu0 %v609_v41, %s956_s2 }
 0x978   :  { %v616_v42 = vpop.permute.xlu0 %615 }
 0x979   :  { %620 = vst.msk [vmem:[#allocation8 + $0x8] sm:$0xff] %vm69_vm1, %v616_v42  ;;  %799 = vmatmul.mubr.msk.f32.vlgmr.msra.gmra.mxu0 %vm69_vm1, %v616_v42 }
 0x97a   :  { %911 = shalt.err (!%p908_p0)
}
 0x97b   :  { %s959_s21 = smov 128   ;;  %s960_s22 = smov 8  }
 0x97c   :  { %725 = dma.vmem_to_hbm [thread:$0]  %s720_s18, 256, %s1225_s7, [#allocation4], %s959_s21, %s959_s21, %s960_s22  }
 0x97d   :  { %s920_s24 = scalar_lea.vmem %s732_s20, 256  ;;  %p925_p2 = scmp.lt.s32.totalorder %s732_s20, %s732_s20 }
 0x97e   :  { %p921_p1 = scmp.ne.s32.totalorder %s732_s20, %s920_s24  ;;  %p926_p3 = scmp.lt.s32.totalorder %s920_s24, %s920_s24 }
 0x980   :  { %p927_p4 = por %p926_p3, %p925_p2 }
 0x982   :  { %p928_p5 = pnand %p927_p4, %p921_p1 }
 0x984   :  { %931 = shalt.err (!%p928_p5)
}
 0x985   :  { %737 = dma.vmem_to_hbm [thread:$0]  %s732_s20, 256, %s1226_s8, [#allocation9], %s959_s21, %s959_s21, %s960_s22   ;;  %vm711_vm9 = vcmask 64512  }
 0x986   :  { %v765_v30 = vld [vmem:[%s1224_s6] ss:$0 sm:$0xff] }
 0xa39   :  { %v800_v43 = vpop.f32.mrf.mxu0 }
 0xa3a   :  { %v708_v44 = vadd.f32 %v800_v43, %v765_v30 }
 0xa3b   :  { %v702_v46 = vpop.f32.mrf.mxu0 }
 0xa3c   :  { %713 = vst.msk [vmem:[%s1227_s9 + $0x8] sm:$0xff] %vm711_vm9, %v708_v44  ;;  %v703_v47 = vadd.f32 %v765_v30, %v702_v46 }
 0xa3e   :  { %712 = vst.msk [vmem:[%s1227_s9] sm:$0xff] %vm711_vm9, %v703_v47 }
 0xa3f   :  { %944 = dma.done.wait [#allocation4], 256  }
 0xa40   :  { %945 = vsyncadd [#allocation4], 4294967040 }
 0xa41   :  { %946 = dma.done.wait [#allocation9], 256  }
 0xa42   :  { %947 = vsyncadd [#allocation9], 4294967040 }
 0xa43   :  { %748 = vsyncpa [#allocation3], 1 }
 0xa44   :  { %749 = vsyncpa [#allocation6], 1 }
 0xa45   :  { %750 = vsyncpa [#allocation4], 1 }
 0xa46   :  { %751 = vsyncpa [#allocation9], 1 }

</bundles_post_ra>
